<compile_context>
chip_gen: v7x
topology: tpu7x:2x2x1
jax: 0.10.0
libtpu: 0.0.40
codegen_flags: <defaults>
</compile_context>

<pallas_src>
import numpy as np
import jax
import jax.numpy as jnp
from jax.experimental import pallas as pl
from jax.experimental.pallas import tpu as pltpu


OUT_SIZE = 299          # nn.Upsample target size
POOL = 8                # surrogate feature pool grid (inception's final 8x8)
N_CLASSES = 1000
K_PAD = 1024            # classes padded to a lane-dense multiple of 128


# ----------------------------------------------------------------------------
# Pallas kernel: fused (upsample+pool) matmul + linear head + softmax
# ----------------------------------------------------------------------------
def _fused_forward_kernel(x_ref, m_ref, w_ref, b_ref, o_ref):
    """One batch tile.

    x_ref: (C, TILE_N, Hin*Win)  image planes, channel-major
    m_ref: (Hin*Win, 64)         fused bilinear-upsample + adaptive-avg-pool
    w_ref: (C, 64, K_PAD)        classifier weights (classes padded to 1024)
    b_ref: (1, K_PAD)            bias (padded classes hold -1e30)
    o_ref: (TILE_N, K_PAD)       softmax probabilities (padded classes ~ 0)
    """
    nchan = x_ref.shape[0]
    logits = b_ref[...]                                   # (1, K_PAD), broadcasts
    for c in range(nchan):                                # C is a tiny static const
        feat_c = jnp.dot(x_ref[c], m_ref[...],
                         preferred_element_type=jnp.float32)       # (TILE_N, 64)
        logits = logits + jnp.dot(feat_c, w_ref[c],
                                  preferred_element_type=jnp.float32)
    m = jnp.max(logits, axis=-1, keepdims=True)
    e = jnp.exp(logits - m)
    s = jnp.sum(e, axis=-1, keepdims=True)
    o_ref[...] = e * pl.reciprocal(s, approx=True)


# ----------------------------------------------------------------------------
# Interpolation / pooling matrices (host-side glue)
# ----------------------------------------------------------------------------
def bilinear_matrix(in_size, out_size):
    """PyTorch bilinear (align_corners=False) 1-D interpolation matrix."""
    scale = in_size / out_size
    dst = np.arange(out_size)
    src = (dst + 0.5) * scale - 0.5
    src = np.maximum(src, 0.0)                       # PyTorch clamps low side
    i0 = np.minimum(np.floor(src).astype(np.int64), in_size - 1)
    i1 = np.minimum(i0 + 1, in_size - 1)
    frac = (src - i0).astype(np.float64)
    M = np.zeros((out_size, in_size), np.float64)
    M[dst, i0] += (1.0 - frac)
    M[dst, i1] += frac
    return M


def adaptive_avg_matrix(in_size, out_size):
    """Adaptive average-pool 1-D matrix (like nn.AdaptiveAvgPool)."""
    M = np.zeros((out_size, in_size), np.float64)
    for o in range(out_size):
        s = (o * in_size) // out_size
        e = -((-(o + 1) * in_size) // out_size)      # ceil((o+1)*in/out)
        M[o, s:e] = 1.0 / (e - s)
    return M


def fuse_surrogate_params(Hin, Win, C, W, b):
    """Compose upsample(299) -> adaptive 8x8 avg-pool into one per-plane
    matrix (exact: both ops are linear) and pad the classifier to a
    lane-dense 1024-class layout."""
    R_up = bilinear_matrix(Hin, OUT_SIZE)                 # (299, Hin)
    C_up = bilinear_matrix(Win, OUT_SIZE)                 # (299, Win)
    R_p = adaptive_avg_matrix(OUT_SIZE, POOL)             # (8, 299)
    R_comb = R_p @ R_up                                   # (8, Hin)
    C_comb = (R_p @ C_up).T                               # (Win, 8)
    # M_pool[(h*Win+w), (g*POOL+o)] = R_comb[g, h] * C_comb[w, o]
    M_pool = np.kron(R_comb.T, C_comb).astype(np.float32)  # (Hin*Win, 64)

    W3 = np.zeros((C, POOL * POOL, K_PAD), np.float32)
    W3[:, :, :N_CLASSES] = np.asarray(W, np.float32).reshape(
        C, POOL * POOL, N_CLASSES)
    b_pad = np.full((1, K_PAD), -1e30, np.float32)        # padded classes -> 0 prob
    b_pad[:, :N_CLASSES] = np.asarray(b, np.float32)
    return jnp.asarray(M_pool), jnp.asarray(W3), jnp.asarray(b_pad)


# ----------------------------------------------------------------------------
# Forward wrapper
# ----------------------------------------------------------------------------
def _round_up(a, m):
    return -(-a // m) * m


def _pick_tile_n(n, c, hw, budget_bytes=8 * 1024 * 1024):
    """Batch tile sized so the double-buffered input block stays well under the
    v7x 32 MiB scoped-VMEM default (64 MiB physical).  Multiple of 8 sublanes."""
    by_vmem = max(8, ((budget_bytes // (c * hw * 4)) // 8) * 8)
    return int(min(128, by_vmem, _round_up(n, 8)))


def inception_score_forward(x, M_pool, W3, b_pad):
    """x: (N, C, Hin, Win) float in [-1, 1]  ->  softmax probs (N, 1000) f32."""
    N, C, Hin, Win = x.shape
    hw = Hin * Win
    tile_n = _pick_tile_n(N, C, hw)
    n_pad = _round_up(N, tile_n)

    # Channel-major flat planes so the kernel only needs 2-D matmuls.
    xc = jnp.transpose(x.astype(jnp.float32), (1, 0, 2, 3)).reshape(C, N, hw)
    if n_pad != N:
        xc = jnp.pad(xc, ((0, 0), (0, n_pad - N), (0, 0)))

    probs_pad = pl.pallas_call(
        _fused_forward_kernel,
        out_shape=jax.ShapeDtypeStruct((n_pad, K_PAD), jnp.float32),
        grid=(n_pad // tile_n,),
        in_specs=[
            pl.BlockSpec((C, tile_n, hw), lambda i: (0, i, 0)),      # streams
            pl.BlockSpec((hw, POOL * POOL), lambda i: (0, 0)),       # resident
            pl.BlockSpec((C, POOL * POOL, K_PAD), lambda i: (0, 0, 0)),  # resident
            pl.BlockSpec((1, K_PAD), lambda i: (0, 0)),              # resident
        ],
        out_specs=pl.BlockSpec((tile_n, K_PAD), lambda i: (i, 0)),
        compiler_params=pltpu.CompilerParams(
            dimension_semantics=("parallel",)),
    )(xc, M_pool, W3, b_pad)
    return probs_pad[:N, :N_CLASSES]


# ----------------------------------------------------------------------------
# Surrogate classifier parameters
# ----------------------------------------------------------------------------
def make_params(key, channels=3):
    feat_dim = channels * POOL * POOL
    kw, kb = jax.random.split(key)
    W = (jax.random.normal(kw, (feat_dim, N_CLASSES), jnp.float32)
         * (1.0 / np.sqrt(feat_dim)))
    b = jax.random.normal(kb, (1, N_CLASSES), jnp.float32) * 0.01
    return W, b


# ----------------------------------------------------------------------------
# Pure-numpy reference of the original two-stage path (for validation)
# ----------------------------------------------------------------------------
def _reference_forward_np(x, W, b):
    x = np.asarray(x, np.float64)
    N, C, Hin, Win = x.shape
    R_up = bilinear_matrix(Hin, OUT_SIZE)
    C_upT = bilinear_matrix(Win, OUT_SIZE).T
    R_p = adaptive_avg_matrix(OUT_SIZE, POOL)
    C_pT = adaptive_avg_matrix(OUT_SIZE, POOL).T
    planes = x.reshape(N * C, Hin, Win)
    up = np.einsum('oh,phw,wq->poq', R_up, planes, C_upT)    # (N*C, 299, 299)
    pooled = np.einsum('gh,phw,wo->pgo', R_p, up, C_pT)      # (N*C, 8, 8)
    feat = pooled.reshape(N, C * POOL * POOL)
    logits = feat @ np.asarray(W, np.float64) + np.asarray(b, np.float64)
    e = np.exp(logits - logits.max(-1, keepdims=True))
    return e / e.sum(-1, keepdims=True)


if __name__ == "__main__":
    key = jax.random.PRNGKey(0)
    kx, kp = jax.random.split(key)

    # Small input consistent with the module's contract (N, 3, H, W) in [-1, 1]
    N, C, H, Wd = 2, 3, 16, 16
    x = jax.random.uniform(kx, (N, C, H, Wd), jnp.float32,
                           minval=-1.0, maxval=1.0)
    W, b = make_params(kp, channels=C)

    M_pool, W3, b_pad = fuse_surrogate_params(H, Wd, C, W, b)
    probs = inception_score_forward(x, M_pool, W3, b_pad)
    probs = jax.block_until_ready(probs)

    assert probs.shape == (N, N_CLASSES)
    assert probs.dtype == jnp.float32
    probs_np = np.asarray(probs)
    assert np.all(np.isfinite(probs_np))
    assert np.all(probs_np >= 0.0)
    row_sums = probs_np.sum(-1)
    assert np.allclose(row_sums, 1.0, atol=2e-3), row_sums

    # The fused single-kernel path must match the original two-stage
    # (bilinear 299 upsample -> adaptive 8x8 pool -> linear -> softmax) math.
    ref = _reference_forward_np(np.asarray(x), np.asarray(W), np.asarray(b))
    assert np.allclose(probs_np, ref, atol=1e-3), float(np.abs(probs_np - ref).max())

    print("KERNEL_OK")
</pallas_src>

<mosaic_0001>
module attributes {stable_mosaic.version = 11 : i64} {
  func.func @_fused_forward_kernel(%arg0: i32, %arg1: memref<3x8x256xf32, #tpu.memory_space<vmem>>, %arg2: memref<256x64xf32, #tpu.memory_space<vmem>>, %arg3: memref<3x64x1024xf32, #tpu.memory_space<vmem>>, %arg4: memref<1x1024xf32, #tpu.memory_space<vmem>>, %arg5: memref<8x1024xf32, #tpu.memory_space<vmem>>) attributes {dimension_semantics = [#tpu.dimension_semantics<parallel>], iteration_bounds = array<i64: 1>, scalar_prefetch = 0 : i64, scratch_operands = 0 : i64, tpu.core_type = #tpu.core_type<tc>, window_params = [{transform_indices = @transform_0, window_bounds = array<i64: 3, 8, 256>}, {pipeline_mode = #tpu.pipeline_mode<synchronous>, transform_indices = @transform_1, window_bounds = array<i64: 256, 64>}, {pipeline_mode = #tpu.pipeline_mode<synchronous>, transform_indices = @transform_2, window_bounds = array<i64: 3, 64, 1024>}, {pipeline_mode = #tpu.pipeline_mode<synchronous>, transform_indices = @transform_3, window_bounds = array<i64: 1, 1024>}, {transform_indices = @transform_4, window_bounds = array<i64: 8, 1024>}]} {
    %c0 = arith.constant 0 : index
    %c0_0 = arith.constant 0 : index
    %0 = vector.load %arg4[%c0, %c0_0] : memref<1x1024xf32, #tpu.memory_space<vmem>>, vector<1x1024xf32>
    %c0_1 = arith.constant 0 : index
    %c0_2 = arith.constant 0 : index
    %c0_3 = arith.constant 0 : index
    %1 = vector.load %arg1[%c0_1, %c0_2, %c0_3] : memref<3x8x256xf32, #tpu.memory_space<vmem>>, vector<1x8x256xf32>
    %2 = vector.shape_cast %1 : vector<1x8x256xf32> to vector<8x256xf32>
    %c0_4 = arith.constant 0 : index
    %c0_5 = arith.constant 0 : index
    %3 = vector.load %arg2[%c0_4, %c0_5] : memref<256x64xf32, #tpu.memory_space<vmem>>, vector<256x64xf32>
    %cst = arith.constant dense<0.000000e+00> : vector<8x64xf32>
    %4 = tpu.matmul %2, %3, %cst {dimension_numbers = #tpu.dot_dimension_numbers<[1], [0], [0], [1], [0, 0, 1, 1], [], []>} : vector<8x256xf32>, vector<256x64xf32>, vector<8x64xf32> -> vector<8x64xf32>
    %c0_6 = arith.constant 0 : index
    %c0_7 = arith.constant 0 : index
    %c0_8 = arith.constant 0 : index
    %5 = vector.load %arg3[%c0_6, %c0_7, %c0_8] : memref<3x64x1024xf32, #tpu.memory_space<vmem>>, vector<1x64x1024xf32>
    %6 = vector.shape_cast %5 : vector<1x64x1024xf32> to vector<64x1024xf32>
    %cst_9 = arith.constant dense<0.000000e+00> : vector<8x1024xf32>
    %7 = tpu.matmul %4, %6, %cst_9 {dimension_numbers = #tpu.dot_dimension_numbers<[1], [0], [0], [1], [0, 0, 1, 1], [], []>} : vector<8x64xf32>, vector<64x1024xf32>, vector<8x1024xf32> -> vector<8x1024xf32>
    %8 = vector.broadcast %0 : vector<1x1024xf32> to vector<8x1024xf32>
    %9 = arith.addf %8, %7 : vector<8x1024xf32>
    %c1 = arith.constant 1 : index
    %c0_10 = arith.constant 0 : index
    %c0_11 = arith.constant 0 : index
    %10 = vector.load %arg1[%c1, %c0_10, %c0_11] : memref<3x8x256xf32, #tpu.memory_space<vmem>>, vector<1x8x256xf32>
    %11 = vector.shape_cast %10 : vector<1x8x256xf32> to vector<8x256xf32>
    %c0_12 = arith.constant 0 : index
    %c0_13 = arith.constant 0 : index
    %12 = vector.load %arg2[%c0_12, %c0_13] : memref<256x64xf32, #tpu.memory_space<vmem>>, vector<256x64xf32>
    %cst_14 = arith.constant dense<0.000000e+00> : vector<8x64xf32>
    %13 = tpu.matmul %11, %12, %cst_14 {dimension_numbers = #tpu.dot_dimension_numbers<[1], [0], [0], [1], [0, 0, 1, 1], [], []>} : vector<8x256xf32>, vector<256x64xf32>, vector<8x64xf32> -> vector<8x64xf32>
    %c1_15 = arith.constant 1 : index
    %c0_16 = arith.constant 0 : index
    %c0_17 = arith.constant 0 : index
    %14 = vector.load %arg3[%c1_15, %c0_16, %c0_17] : memref<3x64x1024xf32, #tpu.memory_space<vmem>>, vector<1x64x1024xf32>
    %15 = vector.shape_cast %14 : vector<1x64x1024xf32> to vector<64x1024xf32>
    %cst_18 = arith.constant dense<0.000000e+00> : vector<8x1024xf32>
    %16 = tpu.matmul %13, %15, %cst_18 {dimension_numbers = #tpu.dot_dimension_numbers<[1], [0], [0], [1], [0, 0, 1, 1], [], []>} : vector<8x64xf32>, vector<64x1024xf32>, vector<8x1024xf32> -> vector<8x1024xf32>
    %17 = arith.addf %9, %16 : vector<8x1024xf32>
    %c2 = arith.constant 2 : index
    %c0_19 = arith.constant 0 : index
    %c0_20 = arith.constant 0 : index
    %18 = vector.load %arg1[%c2, %c0_19, %c0_20] : memref<3x8x256xf32, #tpu.memory_space<vmem>>, vector<1x8x256xf32>
    %19 = vector.shape_cast %18 : vector<1x8x256xf32> to vector<8x256xf32>
    %c0_21 = arith.constant 0 : index
    %c0_22 = arith.constant 0 : index
    %20 = vector.load %arg2[%c0_21, %c0_22] : memref<256x64xf32, #tpu.memory_space<vmem>>, vector<256x64xf32>
    %cst_23 = arith.constant dense<0.000000e+00> : vector<8x64xf32>
    %21 = tpu.matmul %19, %20, %cst_23 {dimension_numbers = #tpu.dot_dimension_numbers<[1], [0], [0], [1], [0, 0, 1, 1], [], []>} : vector<8x256xf32>, vector<256x64xf32>, vector<8x64xf32> -> vector<8x64xf32>
    %c2_24 = arith.constant 2 : index
    %c0_25 = arith.constant 0 : index
    %c0_26 = arith.constant 0 : index
    %22 = vector.load %arg3[%c2_24, %c0_25, %c0_26] : memref<3x64x1024xf32, #tpu.memory_space<vmem>>, vector<1x64x1024xf32>
    %23 = vector.shape_cast %22 : vector<1x64x1024xf32> to vector<64x1024xf32>
    %cst_27 = arith.constant dense<0.000000e+00> : vector<8x1024xf32>
    %24 = tpu.matmul %21, %23, %cst_27 {dimension_numbers = #tpu.dot_dimension_numbers<[1], [0], [0], [1], [0, 0, 1, 1], [], []>} : vector<8x64xf32>, vector<64x1024xf32>, vector<8x1024xf32> -> vector<8x1024xf32>
    %25 = arith.addf %17, %24 : vector<8x1024xf32>
    %cst_28 = arith.constant dense<0xFF800000> : vector<8xf32>
    %26 = vector.multi_reduction <maximumf>, %25, %cst_28 [1] : vector<8x1024xf32> to vector<8xf32>
    %27 = vector.shape_cast %26 : vector<8xf32> to vector<8x1xf32>
    %28 = vector.broadcast %27 : vector<8x1xf32> to vector<8x1024xf32>
    %29 = arith.subf %25, %28 : vector<8x1024xf32>
    %30 = math.exp %29 : vector<8x1024xf32>
    %cst_29 = arith.constant dense<0.000000e+00> : vector<8xf32>
    %31 = vector.multi_reduction <add>, %30, %cst_29 [1] : vector<8x1024xf32> to vector<8xf32>
    %32 = vector.shape_cast %31 : vector<8xf32> to vector<8x1xf32>
    %33 = tpu.reciprocal %32 {approx = true} : vector<8x1xf32> -> vector<8x1xf32>
    %34 = vector.broadcast %33 : vector<8x1xf32> to vector<8x1024xf32>
    %35 = arith.mulf %30, %34 : vector<8x1024xf32>
    %c0_30 = arith.constant 0 : index
    %c0_31 = arith.constant 0 : index
    %36 = vector.load %arg5[%c0_30, %c0_31] : memref<8x1024xf32, #tpu.memory_space<vmem>>, vector<8x1024xf32>
    tpu.vector_store %arg5[%c0_30, %c0_31], %35 {strides = array<i32>} : memref<8x1024xf32, #tpu.memory_space<vmem>>, vector<8x1024xf32>,
    return
  }
  func.func @transform_0(%arg0: i32) -> (i32, i32, i32) {
    %c0_i32 = arith.constant 0 : i32
    %c0_i32_0 = arith.constant 0 : i32
    %c0_i32_1 = arith.constant 0 : i32
    return %c0_i32, %arg0, %c0_i32_0 : i32, i32, i32
  }
  func.func @transform_1(%arg0: i32) -> (i32, i32) {
    %c0_i32 = arith.constant 0 : i32
    %c0_i32_0 = arith.constant 0 : i32
    %c0_i32_1 = arith.constant 0 : i32
    return %c0_i32, %c0_i32_0 : i32, i32
  }
  func.func @transform_2(%arg0: i32) -> (i32, i32, i32) {
    %c0_i32 = arith.constant 0 : i32
    %c0_i32_0 = arith.constant 0 : i32
    %c0_i32_1 = arith.constant 0 : i32
    %c0_i32_2 = arith.constant 0 : i32
    return %c0_i32, %c0_i32_0, %c0_i32_1 : i32, i32, i32
  }
  func.func @transform_3(%arg0: i32) -> (i32, i32) {
    %c0_i32 = arith.constant 0 : i32
    %c0_i32_0 = arith.constant 0 : i32
    %c0_i32_1 = arith.constant 0 : i32
    return %c0_i32, %c0_i32_0 : i32, i32
  }
  func.func @transform_4(%arg0: i32) -> (i32, i32) {
    %c0_i32 = arith.constant 0 : i32
    %c0_i32_0 = arith.constant 0 : i32
    return %arg0, %c0_i32 : i32, i32
  }
}

</mosaic_0001>

<bundles_post_ra>
// kernel: tpu_custom_call.1
= control target key start
LH: loop header
LB: loop body
LE: loop exit
PB: predicated region body
PF: predicated region fallthrough
CT: control target
= control target key end

     0   :  { %9 = vsyncpa [#allocation3], 0  ;;  %s2269_s0 = inlined_call_operand.vmem [shape: f32[3,8,256], index: 0, kind: input, shape index: {}]   ;;  %s2270_s1 = inlined_call_operand.vmem [shape: f32[256,64], index: 1, kind: input, shape index: {}]   ;;  %s2271_s2 = inlined_call_operand.hbm [shape: f32[3,64,1024], index: 2, kind: input, shape index: {}]   ;;  %s2272_s3 = inlined_call_operand.vmem [shape: f32[1,1024], index: 3, kind: input, shape index: {}]   ;;  %s2273_s4 = inlined_call_operand.hbm [shape: f32[8,1024], index: 4, kind: output, shape index: {}]  }
   0x1   :  { %10 = vsyncpa [#allocation4], 0  ;;  %s1982_s15 = smov [#allocation2]   ;;  %s1934_s19 = scalar_lea.hbm %s2271_s2, 24576 }
   0x2   :  { %s20_s16 = sshll.u32 %s1982_s15, 4  ;;  %p1935_p0 = scmp.ne.s32.totalorder %s2271_s2, %s1934_s19  ;;  %s21_s16 = int_to_ptr.vmem [resolvable:$true] %s20_s16 }
   0x3   :  { %p1938_p1 = scmp.lt.u32.totalorder %s1934_s19, %s2271_s2 }
   0x5   :  { %p1940_p2 = pnand %p1938_p1, %p1935_p0 }
   0x7   :  { %1943 = shalt.err (!%p1940_p2)
}
   0x8   :  { %s1944_s24 = scalar_lea.vmem %s21_s16, 24576  ;;  %p1949_p4 = scmp.lt.s32.totalorder %s21_s16, %s21_s16 }
   0x9   :  { %p1945_p3 = scmp.ne.s32.totalorder %s21_s16, %s1944_s24  ;;  %p1950_p5 = scmp.lt.s32.totalorder %s1944_s24, %s1944_s24 }
   0xb   :  { %p1951_p6 = por %p1950_p5, %p1949_p4 }
   0xd   :  { %p1952_p7 = pnand %p1951_p6, %p1945_p3 }
   0xf   :  { %1955 = shalt.err (!%p1952_p7)
}
  0x10   :  { %s1983_s25 = smov 1024   ;;  %s1984_s26 = smov 64  }
  0x11   :  { %26 = dma.hbm_to_vmem [thread:$0]  %s2271_s2, 24576, %s21_s16, [#allocation3], %s1983_s25, %s1983_s25, %s1984_s26  }
  0x12   :  { %1978 = dma.done.wait [#allocation3], 24576  }
  0x13   :  { %1979 = vsyncadd [#allocation3], 4294942720  ;;  %v51_v0 = vld [vmem:[%s2270_s1 + $0x80] sm:$0xff]  ;;  %v52_v1 = vld [vmem:[%s2270_s1 + $0x88] sm:$0xff]  ;;  %vm201_vm0 = vcmask 523264  }
  0x14   :  { %v35_v2 = vld [vmem:[%s2270_s1] sm:$0xff]  ;;  %v2033_v3 = vpack.c.bf16 %v52_v1, %v51_v0  ;;  %v36_v4 = vld [vmem:[%s2270_s1 + $0x8] sm:$0xff]  ;;  %v53_v5 = vld [vmem:[%s2270_s1 + $0x90] sm:$0xff] }
  0x15   :  { %v54_v6 = vld [vmem:[%s2270_s1 + $0x98] sm:$0xff]  ;;  %v2044_v7 = vpack.c.bf16 %v36_v4, %v35_v2  ;;  %v37_v9 = vld [vmem:[%s2270_s1 + $0x10] sm:$0xff]  ;;  %v55_v11 = vld [vmem:[%s2270_s1 + $0xa0] sm:$0xff] }
  0x16   :  { %v2046_v8 = vpack.c.bf16 %v54_v6, %v53_v5  ;;  %v38_v10 = vld [vmem:[%s2270_s1 + $0x18] sm:$0xff]  ;;  %1600 = vmatprep.subr.bf16.mxu0 %v2033_v3  ;;  %v56_v12 = vld [vmem:[%s2270_s1 + $0xa8] sm:$0xff]  ;;  %v39_v15 = vld [vmem:[%s2270_s1 + $0x20] sm:$0xff] }
  0x17   :  { %1602 = vmatpush3.bf16.msra.mxu0 %v2044_v7  ;;  %v2062_v13 = vpack.c.bf16 %v38_v10, %v37_v9  ;;  %v2065_v14 = vpack.c.bf16 %v56_v12, %v55_v11  ;;  %v40_v16 = vld [vmem:[%s2270_s1 + $0x28] sm:$0xff]  ;;  %v57_v17 = vld [vmem:[%s2270_s1 + $0xb0] sm:$0xff]  ;;  %v58_v18 = vld [vmem:[%s2270_s1 + $0xb8] sm:$0xff] }
  0x18   :  { %1604 = vmatprep.subr.bf16.mxu0 %v2046_v8  ;;  %v2080_v19 = vpack.c.bf16 %v40_v16, %v39_v15  ;;  %v2083_v20 = vpack.c.bf16 %v58_v18, %v57_v17  ;;  %v41_v21 = vld [vmem:[%s2270_s1 + $0x30] sm:$0xff]  ;;  %v42_v22 = vld [vmem:[%s2270_s1 + $0x38] sm:$0xff]  ;;  %v59_v23 = vld [vmem:[%s2270_s1 + $0xc0] sm:$0xff] }
  0x19   :  { %v60_v24 = vld [vmem:[%s2270_s1 + $0xc8] sm:$0xff]  ;;  %v2101_v28 = vpack.c.bf16 %v42_v22, %v41_v21  ;;  %v43_v29 = vld [vmem:[%s2270_s1 + $0x40] sm:$0xff]  ;;  %v61_v34 = vld [vmem:[%s2270_s1 + $0xd0] sm:$0xff] }
  0x1a   :  { %v34_v25 = vld [vmem:[%s2269_s0 + $0x8] sm:$0xff]  ;;  %v137_v31 = vld [vmem:[#allocation2] sm:$0xff]  ;;  %v2107_v32 = vpack.c.bf16 %v60_v24, %v59_v23  ;;  %v62_v36 = vld [vmem:[%s2270_s1 + $0xd8] sm:$0xff] }
  0x1b   :  { %1606 = vmatpush3.bf16.msra.mxu0 %v2062_v13  ;;  %131 = vmatprep.mubr.f32.mxu0 %v34_v25  ;;  %v138_v26 = vld [vmem:[#allocation2 + $0x8] sm:$0xff]  ;;  %v145_v35 = vld [vmem:[#allocation2 + $0x40] sm:$0xff]  ;;  %v45_v44 = vld [vmem:[%s2270_s1 + $0x50] sm:$0xff]  ;;  %v2125_v47 = vpack.c.bf16 %v62_v36, %v61_v34 }
  0x1c   :  { %1608 = vmatprep.subr.bf16.mxu0 %v2065_v14  ;;  %v146_v27 = vld [vmem:[#allocation2 + $0x48] sm:$0xff]  ;;  %v1633_v37 = vpack.c.bf16 %v145_v35, %v137_v31  ;;  %v153_v41 = vld [vmem:[#allocation2 + $0x80] sm:$0xff]  ;;  %v46_v48 = vld [vmem:[%s2270_s1 + $0x58] sm:$0xff] }
  0x1d   :  { %v1631_v30 = vpack.c.bf16 %v146_v27, %v138_v26  ;;  %v44_v33 = vld [vmem:[%s2270_s1 + $0x48] sm:$0xff]  ;;  %v161_v42 = vld [vmem:[#allocation2 + $0xc0] sm:$0xff]  ;;  %v2137_v57 = vpack.c.bf16 %v46_v48, %v45_v44  ;;  %v65_v63 = vld [vmem:[%s2270_s1 + $0xf0] sm:$0xff]  ;;  %v1985_v48 = vmov 0.0  }
  0x1e   :  { %v154_v38 = vld [vmem:[#allocation2 + $0x88] sm:$0xff]  ;;  %v2119_v43 = vpack.c.bf16 %v44_v33, %v43_v29  ;;  %v1637_v45 = vpack.c.bf16 %v161_v42, %v153_v41  ;;  %v63_v49 = vld [vmem:[%s2270_s1 + $0xe0] sm:$0xff]  ;;  %v66_v0 = vld [vmem:[%s2270_s1 + $0xf8] sm:$0xff]  ;;  %269 = vmatprep.mubr.f32.mxu1 %v1985_v48 }
  0x1f   :  { %1610 = vmatpush3.bf16.msra.mxu0 %v2080_v19  ;;  %1632 = vmatprep.subr.bf16.mxu1 %v1631_v30  ;;  %v162_v39 = vld [vmem:[#allocation2 + $0xc8] sm:$0xff]  ;;  %v169_v53 = vld [vmem:[#allocation2 + $0x100] sm:$0xff]  ;;  %v2158_v2 = vpack.c.bf16 %v66_v0, %v65_v63  ;;  %v49_v4 = vld [vmem:[%s2270_s1 + $0x70] sm:$0xff] }
  0x20   :  { %1612 = vmatprep.subr.bf16.mxu0 %v2083_v20  ;;  %v1635_v40 = vpack.c.bf16 %v162_v39, %v154_v38  ;;  %1634 = vmatpush1.bf16.msra.mxu1 %v1633_v37  ;;  %v170_v46 = vld [vmem:[#allocation2 + $0x108] sm:$0xff]  ;;  %v177_v54 = vld [vmem:[#allocation2 + $0x140] sm:$0xff]  ;;  %v50_v5 = vld [vmem:[%s2270_s1 + $0x78] sm:$0xff] }
  0x21   :  { %v178_v50 = vld [vmem:[#allocation2 + $0x148] sm:$0xff]  ;;  %v1641_v58 = vpack.c.bf16 %v177_v54, %v169_v53  ;;  %v47_v60 = vld [vmem:[%s2270_s1 + $0x60] sm:$0xff]  ;;  %v2167_v10 = vpack.c.bf16 %v50_v5, %v49_v4  ;;  %v140_v44 = vld [vmem:[#allocation2 + $0x18] sm:$0xff] }
  0x22   :  { %1636 = vmatprep.subr.bf16.mxu1 %v1635_v40  ;;  %v64_v51 = vld [vmem:[%s2270_s1 + $0xe8] sm:$0xff]  ;;  %v1639_v52 = vpack.c.bf16 %v178_v50, %v170_v46  ;;  %v141_v12 = vld [vmem:[#allocation2 + $0x20] sm:$0xff]  ;;  %v147_v50 = vld [vmem:[#allocation2 + $0x50] sm:$0xff] }
  0x23   :  { %1614 = vmatpush3.bf16.msra.mxu0 %v2101_v28  ;;  %v186_v55 = vld [vmem:[#allocation2 + $0x188] sm:$0xff]  ;;  %v2140_v59 = vpack.c.bf16 %v64_v51, %v63_v49  ;;  %v149_v15 = vld [vmem:[#allocation2 + $0x60] sm:$0xff]  ;;  %v139_v49 = vld [vmem:[#allocation2 + $0x10] sm:$0xff] }
  0x24   :  { %1616 = vmatprep.subr.bf16.mxu0 %v2107_v32  ;;  %v194_v56 = vld [vmem:[#allocation2 + $0x1c8] sm:$0xff]  ;;  %1638 = vmatpush1.bf16.msra.mxu1 %v1637_v45  ;;  %v33_v18 = vld [vmem:[%s2269_s0] sm:$0xff]  ;;  %v1665_v21 = vpack.c.bf16 %v149_v15, %v141_v12  ;;  %v148_v45 = vld [vmem:[#allocation2 + $0x58] sm:$0xff] }
  0x25   :  { %v48_v61 = vld [vmem:[%s2270_s1 + $0x68] sm:$0xff]  ;;  %1640 = vmatprep.subr.bf16.mxu1 %v1639_v52  ;;  %v1643_v62 = vpack.c.bf16 %v194_v56, %v186_v55  ;;  %v157_v23 = vld [vmem:[#allocation2 + $0xa0] sm:$0xff]  ;;  %v1647_v46 = vpack.c.bf16 %v148_v45, %v140_v44  ;;  %v156_v51 = vld [vmem:[#allocation2 + $0x98] sm:$0xff]  ;;  %v1649_v55 = vpack.c.bf16 %v147_v50, %v139_v49 }
  0x26   :  { %v2155_v1 = vpack.c.bf16 %v48_v61, %v47_v60  ;;  %v142_v6 = vld [vmem:[#allocation2 + $0x28] sm:$0xff]  ;;  %v165_v24 = vld [vmem:[#allocation2 + $0xe0] sm:$0xff]  ;;  %v164_v52 = vld [vmem:[#allocation2 + $0xd8] sm:$0xff] }
  0x27   :  { %1618 = vmatpush3.bf16.msra.mxu0 %v2119_v43  ;;  %v150_v9 = vld [vmem:[#allocation2 + $0x68] sm:$0xff]  ;;  %v1669_v27 = vpack.c.bf16 %v165_v24, %v157_v23  ;;  %v173_v30 = vld [vmem:[#allocation2 + $0x120] sm:$0xff]  ;;  %v155_v60 = vld [vmem:[#allocation2 + $0x90] sm:$0xff] }
  0x28   :  { %1620 = vmatprep.subr.bf16.mxu0 %v2125_v47  ;;  %1642 = vmatpush1.bf16.msra.mxu1 %v1641_v58  ;;  %v1663_v11 = vpack.c.bf16 %v150_v9, %v142_v6  ;;  %v158_v16 = vld [vmem:[#allocation2 + $0xa8] sm:$0xff]  ;;  %v181_v31 = vld [vmem:[#allocation2 + $0x160] sm:$0xff]  ;;  %v1651_v58 = vpack.c.bf16 %v164_v52, %v156_v51  ;;  %v163_v61 = vld [vmem:[#allocation2 + $0xd0] sm:$0xff] }
  0x29   :  { %1644 = vmatprep.subr.bf16.mxu1 %v1643_v62  ;;  %v166_v17 = vld [vmem:[#allocation2 + $0xe8] sm:$0xff]  ;;  %v1673_v35 = vpack.c.bf16 %v181_v31, %v173_v30  ;;  %v185_v37 = vld [vmem:[#allocation2 + $0x180] sm:$0xff]  ;;  %v172_v62 = vld [vmem:[#allocation2 + $0x118] sm:$0xff]  ;;  %v1653_v4 = vpack.c.bf16 %v163_v61, %v155_v60 }
  0x2a   :  { %v1667_v22 = vpack.c.bf16 %v166_v17, %v158_v16  ;;  %v174_v25 = vld [vmem:[#allocation2 + $0x128] sm:$0xff]  ;;  %v193_v38 = vld [vmem:[#allocation2 + $0x1c0] sm:$0xff]  ;;  %v180_v63 = vld [vmem:[#allocation2 + $0x158] sm:$0xff] }
  0x2b   :  { %1622 = vmatpush3.bf16.msra.mxu0 %v2137_v57  ;;  %v182_v26 = vld [vmem:[#allocation2 + $0x168] sm:$0xff]  ;;  %v189_v39 = vld [vmem:[#allocation2 + $0x1a0] sm:$0xff]  ;;  %v1645_v40 = vpack.c.bf16 %v193_v38, %v185_v37  ;;  %v1483_v0 = vld [vmem:[%s2269_s0 + $0x18] sm:$0xff]  ;;  %v1655_v5 = vpack.c.bf16 %v180_v63, %v172_v62 }
  0x2c   :  { %1624 = vmatprep.subr.bf16.mxu0 %v2140_v59  ;;  %v1671_v29 = vpack.c.bf16 %v182_v26, %v174_v25  ;;  %v190_v33 = vld [vmem:[#allocation2 + $0x1a8] sm:$0xff]  ;;  %v197_v41 = vld [vmem:[#allocation2 + $0x1e0] sm:$0xff]  ;;  %v171_v6 = vld [vmem:[#allocation2 + $0x110] sm:$0xff] }
  0x2d   :  { %v198_v34 = vld [vmem:[#allocation2 + $0x1e8] sm:$0xff]  ;;  %v1677_v42 = vpack.c.bf16 %v197_v41, %v189_v39  ;;  %1646 = vmatpush1.bf16.msra.mxu1 %v1645_v40  ;;  %v179_v9 = vld [vmem:[#allocation2 + $0x150] sm:$0xff]  ;;  %v196_v12 = vld [vmem:[#allocation2 + $0x1d8] sm:$0xff] }
  0x2e   :  { %v1675_v36 = vpack.c.bf16 %v198_v34, %v190_v33  ;;  %1648 = vmatprep.subr.bf16.mxu1 %v1647_v46  ;;  %v1657_v15 = vpack.c.bf16 %v179_v9, %v171_v6  ;;  %v187_v17 = vld [vmem:[#allocation2 + $0x190] sm:$0xff]  ;;  %v192_v41 = vld [vmem:[#allocation2 + $0x1b8] sm:$0xff]  ;;  %v613_v50 = vld [vmem:[#allocation2 + $0x208] sm:$0xff] }
  0x2f   :  { %1626 = vmatpush3.bf16.msra.mxu0 %v2155_v1  ;;  %v143_v25 = vld [vmem:[#allocation2 + $0x30] sm:$0xff]  ;;  %v621_v51 = vld [vmem:[#allocation2 + $0x248] sm:$0xff]  ;;  %v616_v62 = vld [vmem:[#allocation2 + $0x220] sm:$0xff] }
  0x30   :  { %1628 = vmatprep.subr.bf16.mxu0 %v2158_v2  ;;  %v151_v26 = vld [vmem:[#allocation2 + $0x70] sm:$0xff]  ;;  %v617_v52 = vld [vmem:[#allocation2 + $0x228] sm:$0xff]  ;;  %v1727_v60 = vpack.c.bf16 %v621_v51, %v613_v50  ;;  %v624_v63 = vld [vmem:[#allocation2 + $0x260] sm:$0xff] }
  0x31   :  { %v1681_v30 = vpack.c.bf16 %v151_v26, %v143_v25  ;;  %v159_v33 = vld [vmem:[#allocation2 + $0xb0] sm:$0xff]  ;;  %v641_v6 = vld [vmem:[#allocation2 + $0x2e8] sm:$0xff]  ;;  %v672_v51 = vld [vmem:[#allocation2 + $0x3e0] sm:$0xff] }
  0x32   :  { %v167_v34 = vld [vmem:[#allocation2 + $0xf0] sm:$0xff]  ;;  %v649_v25 = vld [vmem:[#allocation2 + $0x328] sm:$0xff] }
  0x33   :  { %1630 = vmatpush3.bf16.msra.mxu0 %v2167_v10  ;;  %v1685_v37 = vpack.c.bf16 %v167_v34, %v159_v33  ;;  %v175_v39 = vld [vmem:[#allocation2 + $0x130] sm:$0xff]  ;;  %v657_v26 = vld [vmem:[#allocation2 + $0x368] sm:$0xff] }
  0x34   :  { %1664 = vmatprep.subr.bf16.mxu0 %v1663_v11  ;;  %v188_v11 = vld [vmem:[#allocation2 + $0x198] sm:$0xff]  ;;  %v183_v40 = vld [vmem:[#allocation2 + $0x170] sm:$0xff]  ;;  %v1767_v34 = vpack.c.bf16 %v657_v26, %v649_v25 }
  0x35   :  { %v1659_v16 = vpack.c.bf16 %v196_v12, %v188_v11  ;;  %v1689_v44 = vpack.c.bf16 %v183_v40, %v175_v39  ;;  %v191_v46 = vld [vmem:[#allocation2 + $0x1b0] sm:$0xff]  ;;  %v1761_v12 = vpack.c.bf16 %v624_v63, %v616_v62  ;;  %v665_v39 = vld [vmem:[#allocation2 + $0x3a8] sm:$0xff]  ;;  %v639_v62 = vld [vmem:[#allocation2 + $0x2d8] sm:$0xff] }
  0x36   :  { %132 = vmatmul.mubr.f32.vlgmr.msra.gmra.mrb[0].mxu0 %v33_v18  ;;  %v195_v18 = vld [vmem:[#allocation2 + $0x1d0] sm:$0xff]  ;;  %v673_v40 = vld [vmem:[#allocation2 + $0x3e8] sm:$0xff] }
  0x37   :  { %1666 = vmatpush1.bf16.msra.mxu0 %v1665_v21  ;;  %411 = vmatprep.mubr.f32.mxu0 %v1985_v48  ;;  %v144_v21 = vld [vmem:[#allocation2 + $0x38] sm:$0xff]  ;;  %v1661_v23 = vpack.c.bf16 %v195_v18, %v187_v17  ;;  %v199_v49 = vld [vmem:[#allocation2 + $0x1f0] sm:$0xff] }
  0x38   :  { %1668 = vmatprep.subr.bf16.mxu0 %v1667_v22  ;;  %v152_v22 = vld [vmem:[#allocation2 + $0x78] sm:$0xff]  ;;  %v1482_v9 = vld [vmem:[%s2269_s0 + $0x10] sm:$0xff] }
  0x39   :  { %v1679_v24 = vpack.c.bf16 %v152_v22, %v144_v21  ;;  %v632_v21 = vld [vmem:[#allocation2 + $0x2a0] sm:$0xff]  ;;  %v662_v25 = vld [vmem:[#allocation2 + $0x390] sm:$0xff] }
  0x3a   :  { %v640_v22 = vld [vmem:[#allocation2 + $0x2e0] sm:$0xff]  ;;  %v670_v26 = vld [vmem:[#allocation2 + $0x3d0] sm:$0xff] }
  0x3b   :  { %1670 = vmatpush1.bf16.msra.mxu0 %v1669_v27  ;;  %v160_v27 = vld [vmem:[#allocation2 + $0xb8] sm:$0xff] }
  0x3c   :  { %1672 = vmatprep.subr.bf16.mxu0 %v1671_v29  ;;  %v168_v29 = vld [vmem:[#allocation2 + $0xf8] sm:$0xff] }
  0x3d   :  { %v1683_v31 = vpack.c.bf16 %v168_v29, %v160_v27  ;;  %v1765_v29 = vpack.c.bf16 %v640_v22, %v632_v21  ;;  %v654_v21 = vld [vmem:[#allocation2 + $0x350] sm:$0xff]  ;;  %v663_v22 = vld [vmem:[#allocation2 + $0x398] sm:$0xff] }
  0x3f   :  { %1674 = vmatpush1.bf16.msra.mxu0 %v1673_v35  ;;  %v176_v35 = vld [vmem:[#allocation2 + $0x138] sm:$0xff] }
  0x40   :  { %1676 = vmatprep.subr.bf16.mxu0 %v1675_v36  ;;  %v184_v36 = vld [vmem:[#allocation2 + $0x178] sm:$0xff] }
  0x41   :  { %v1687_v38 = vpack.c.bf16 %v184_v36, %v176_v35  ;;  %v648_v35 = vld [vmem:[#allocation2 + $0x320] sm:$0xff] }
  0x42   :  { %v656_v36 = vld [vmem:[#allocation2 + $0x360] sm:$0xff] }
  0x43   :  { %1678 = vmatpush1.bf16.msra.mxu0 %v1677_v42  ;;  %v200_v42 = vld [vmem:[#allocation2 + $0x1f8] sm:$0xff] }
  0x44   :  { %1696 = vmatprep.subr.bf16.mxu0 %v2033_v3  ;;  %v1691_v45 = vpack.c.bf16 %v200_v42, %v192_v41  ;;  %v1769_v41 = vpack.c.bf16 %v656_v36, %v648_v35  ;;  %v634_v36 = vld [vmem:[#allocation2 + $0x2b0] sm:$0xff] }
 0x109   :  { %v1526_v53 = vpop.f32.mrb[0].mxu0 }
 0x10a   :  { %v1527_v54 = vpop.f32.mrb[1].mxu0 }
 0x10b   :  { %v2177_v56 = vadd.f32 %v1527_v54, %v1526_v53  ;;  %v625_v53 = vld [vmem:[#allocation2 + $0x268] sm:$0xff]  ;;  %v1693_v54 = vpack.c.bf16 %v199_v49, %v191_v46  ;;  %v668_v46 = vld [vmem:[#allocation2 + $0x3c0] sm:$0xff] }
 0x10c   :  { %v1759_v61 = vpack.c.bf16 %v625_v53, %v617_v52  ;;  %v664_v49 = vld [vmem:[#allocation2 + $0x3a0] sm:$0xff]  ;;  %v615_v53 = vld [vmem:[#allocation2 + $0x218] sm:$0xff] }
 0x10d   :  { %1478 = vmatmul.mubr.msk.f32.vlgmr.msra.gmra.mrb[0].mxu1 %vm201_vm0, %v2177_v56  ;;  %1480 = vmatmul.mubr.msk.f32.vlgmr.msra.gmra.mrb[2].mxu0 %vm201_vm0, %v2177_v56  ;;  %v1773_v52 = vpack.c.bf16 %v672_v51, %v664_v49  ;;  %v1058_v49 = vld [vmem:[#allocation2 + $0x468] sm:$0xff]  ;;  %v1045_v51 = vld [vmem:[#allocation2 + $0x400] sm:$0xff] }
 0x10e   :  { %1650 = vmatpush1.bf16.msra.mxu1 %v1649_v55  ;;  %1698 = vmatpush3.bf16.msra.mxu0 %v2044_v7  ;;  %v612_v55 = vld [vmem:[#allocation2 + $0x200] sm:$0xff] }
 0x10f   :  { %1652 = vmatprep.subr.bf16.mxu1 %v1651_v58  ;;  %1700 = vmatprep.subr.bf16.mxu0 %v2046_v8  ;;  %v620_v58 = vld [vmem:[#allocation2 + $0x240] sm:$0xff] }
 0x110   :  { %340 = vmatprep.mubr.f32.mxu1 %v1985_v48  ;;  %605 = vmatprep.mubr.f32.mxu0 %v1483_v0  ;;  %v629_v0 = vld [vmem:[#allocation2 + $0x288] sm:$0xff]  ;;  %v1729_v11 = vpack.c.bf16 %v620_v58, %v612_v55  ;;  %v614_v58 = vld [vmem:[#allocation2 + $0x210] sm:$0xff] }
 0x112   :  { %1654 = vmatpush1.bf16.msra.mxu1 %v1653_v4  ;;  %1702 = vmatpush3.bf16.msra.mxu0 %v2062_v13  ;;  %v637_v4 = vld [vmem:[#allocation2 + $0x2c8] sm:$0xff] }
 0x113   :  { %1656 = vmatprep.subr.bf16.mxu1 %v1655_v5  ;;  %1704 = vmatprep.subr.bf16.mxu0 %v2065_v14  ;;  %v633_v5 = vld [vmem:[#allocation2 + $0x2a8] sm:$0xff]  ;;  %v1731_v17 = vpack.c.bf16 %v637_v4, %v629_v0 }
 0x114   :  { %v1763_v18 = vpack.c.bf16 %v641_v6, %v633_v5 }
 0x116   :  { %1658 = vmatpush1.bf16.msra.mxu1 %v1657_v15  ;;  %1706 = vmatpush3.bf16.msra.mxu0 %v2080_v19  ;;  %v628_v15 = vld [vmem:[#allocation2 + $0x280] sm:$0xff] }
 0x117   :  { %1660 = vmatprep.subr.bf16.mxu1 %v1659_v16  ;;  %1708 = vmatprep.subr.bf16.mxu0 %v2083_v20  ;;  %v636_v16 = vld [vmem:[#allocation2 + $0x2c0] sm:$0xff] }
 0x118   :  { %v1733_v27 = vpack.c.bf16 %v636_v16, %v628_v15  ;;  %v655_v15 = vld [vmem:[#allocation2 + $0x358] sm:$0xff] }
 0x11a   :  { %1662 = vmatpush1.bf16.msra.mxu1 %v1661_v23  ;;  %1710 = vmatpush3.bf16.msra.mxu0 %v2101_v28  ;;  %v645_v23 = vld [vmem:[#allocation2 + $0x308] sm:$0xff] }
 0x11b   :  { %1680 = vmatprep.subr.bf16.mxu1 %v1679_v24  ;;  %1712 = vmatprep.subr.bf16.mxu0 %v2107_v32  ;;  %v653_v24 = vld [vmem:[#allocation2 + $0x348] sm:$0xff] }
 0x11c   :  { %v1735_v33 = vpack.c.bf16 %v653_v24, %v645_v23  ;;  %v671_v23 = vld [vmem:[#allocation2 + $0x3d8] sm:$0xff] }
 0x11d   :  { %1479 = vmatmul.mubr.msk.f32.vlgmr.msra.gmra.mrb[2].mxu1 %vm201_vm0, %v2177_v56 }
 0x11e   :  { %1682 = vmatpush1.bf16.msra.mxu1 %v1681_v30  ;;  %1714 = vmatpush3.bf16.msra.mxu0 %v2119_v43  ;;  %v644_v30 = vld [vmem:[#allocation2 + $0x300] sm:$0xff] }
 0x11f   :  { %1684 = vmatprep.subr.bf16.mxu1 %v1683_v31  ;;  %1716 = vmatprep.subr.bf16.mxu0 %v2125_v47  ;;  %v652_v31 = vld [vmem:[#allocation2 + $0x340] sm:$0xff] }
 0x120   :  { %482 = vmatprep.mubr.f32.mxu1 %v1985_v48 }
 0x122   :  { %1686 = vmatpush1.bf16.msra.mxu1 %v1685_v37  ;;  %1718 = vmatpush3.bf16.msra.mxu0 %v2137_v57  ;;  %v661_v37 = vld [vmem:[#allocation2 + $0x388] sm:$0xff] }
 0x123   :  { %1688 = vmatprep.subr.bf16.mxu1 %v1687_v38  ;;  %1720 = vmatprep.subr.bf16.mxu0 %v2140_v59  ;;  %v669_v38 = vld [vmem:[#allocation2 + $0x3c8] sm:$0xff] }
 0x124   :  { %v1739_v42 = vpack.c.bf16 %v669_v38, %v661_v37  ;;  %v642_v37 = vld [vmem:[#allocation2 + $0x2f0] sm:$0xff]  ;;  %v659_v38 = vld [vmem:[#allocation2 + $0x378] sm:$0xff] }
 0x126   :  { %1690 = vmatpush1.bf16.msra.mxu1 %v1689_v44  ;;  %1722 = vmatpush3.bf16.msra.mxu0 %v2155_v1  ;;  %v1771_v44 = vpack.c.bf16 %v673_v40, %v665_v39  ;;  %v650_v39 = vld [vmem:[#allocation2 + $0x330] sm:$0xff] }
 0x127   :  { %1692 = vmatprep.subr.bf16.mxu1 %v1691_v45  ;;  %1724 = vmatprep.subr.bf16.mxu0 %v2158_v2  ;;  %v660_v45 = vld [vmem:[#allocation2 + $0x380] sm:$0xff]  ;;  %v658_v40 = vld [vmem:[#allocation2 + $0x370] sm:$0xff] }
 0x128   :  { %v1741_v50 = vpack.c.bf16 %v668_v46, %v660_v45  ;;  %v1046_v45 = vld [vmem:[#allocation2 + $0x408] sm:$0xff] }
 0x129   :  { %v1054_v46 = vld [vmem:[#allocation2 + $0x448] sm:$0xff] }
 0x12a   :  { %1694 = vmatpush1.bf16.msra.mxu1 %v1693_v54  ;;  %1726 = vmatpush3.bf16.msra.mxu0 %v2167_v10  ;;  %v623_v54 = vld [vmem:[#allocation2 + $0x258] sm:$0xff] }
 0x12b   :  { %1728 = vmatprep.subr.bf16.mxu1 %v1727_v60  ;;  %1760 = vmatprep.subr.bf16.mxu0 %v1759_v61  ;;  %v1743_v55 = vpack.c.bf16 %v623_v54, %v615_v53  ;;  %v622_v60 = vld [vmem:[#allocation2 + $0x250] sm:$0xff]  ;;  %v631_v61 = vld [vmem:[#allocation2 + $0x298] sm:$0xff]  ;;  %v1049_v54 = vld [vmem:[#allocation2 + $0x420] sm:$0xff] }
 0x12c   :  { %v1745_v4 = vpack.c.bf16 %v622_v60, %v614_v58  ;;  %v1747_v6 = vpack.c.bf16 %v639_v62, %v631_v61  ;;  %v1070_v58 = vld [vmem:[#allocation2 + $0x4c8] sm:$0xff] }
 0x12d   :  { %1481 = vmatmul.mubr.msk.f32.vlgmr.msra.gmra.mrb[4].mxu1 %vm201_vm0, %v2177_v56  ;;  %606 = vmatmul.mubr.f32.vlgmr.msra.gmra.mrb[4].mxu0 %v1482_v9  ;;  %v1737_v56 = vpack.c.bf16 %v652_v31, %v644_v30  ;;  %v630_v9 = vld [vmem:[#allocation2 + $0x290] sm:$0xff]  ;;  %v1066_v60 = vld [vmem:[#allocation2 + $0x4a8] sm:$0xff] }
 0x12e   :  { %1730 = vmatpush1.bf16.msra.mxu1 %v1729_v11  ;;  %1762 = vmatpush1.bf16.msra.mxu0 %v1761_v12  ;;  %v638_v11 = vld [vmem:[#allocation2 + $0x2d0] sm:$0xff]  ;;  %v647_v12 = vld [vmem:[#allocation2 + $0x318] sm:$0xff]  ;;  %v1074_v61 = vld [vmem:[#allocation2 + $0x4e8] sm:$0xff] }
 0x12f   :  { %1732 = vmatprep.subr.bf16.mxu1 %v1731_v17  ;;  %1764 = vmatprep.subr.bf16.mxu0 %v1763_v18  ;;  %v1749_v16 = vpack.c.bf16 %v638_v11, %v630_v9  ;;  %v1751_v17 = vpack.c.bf16 %v655_v15, %v647_v12  ;;  %v646_v18 = vld [vmem:[#allocation2 + $0x310] sm:$0xff]  ;;  %v1065_v9 = vld [vmem:[#allocation2 + $0x4a0] sm:$0xff]  ;;  %v1078_v12 = vld [vmem:[#allocation2 + $0x508] sm:$0xff] }
 0x130   :  { %743 = vmatprep.mubr.f32.mxu1 %v1985_v48  ;;  %885 = vmatprep.mubr.f32.mxu0 %v1985_v48  ;;  %v1753_v24 = vpack.c.bf16 %v654_v21, %v646_v18  ;;  %v618_v31 = vld [vmem:[#allocation2 + $0x230] sm:$0xff]  ;;  %v1073_v11 = vld [vmem:[#allocation2 + $0x4e0] sm:$0xff]  ;;  %v1086_v15 = vld [vmem:[#allocation2 + $0x548] sm:$0xff] }
 0x131   :  { %v1077_v18 = vld [vmem:[#allocation2 + $0x500] sm:$0xff]  ;;  %v1831_v21 = vpack.c.bf16 %v1086_v15, %v1078_v12  ;;  %v1075_v12 = vld [vmem:[#allocation2 + $0x4f0] sm:$0xff]  ;;  %v1084_v15 = vld [vmem:[#allocation2 + $0x538] sm:$0xff] }
 0x132   :  { %1734 = vmatpush1.bf16.msra.mxu1 %v1733_v27  ;;  %1766 = vmatpush1.bf16.msra.mxu0 %v1765_v29  ;;  %v619_v27 = vld [vmem:[#allocation2 + $0x238] sm:$0xff]  ;;  %v1757_v29 = vpack.c.bf16 %v670_v26, %v662_v25  ;;  %v1094_v25 = vld [vmem:[#allocation2 + $0x588] sm:$0xff] }
 0x133   :  { %1736 = vmatprep.subr.bf16.mxu1 %v1735_v33  ;;  %1768 = vmatprep.subr.bf16.mxu0 %v1767_v34  ;;  %v626_v33 = vld [vmem:[#allocation2 + $0x270] sm:$0xff]  ;;  %v643_v34 = vld [vmem:[#allocation2 + $0x2f8] sm:$0xff]  ;;  %v1102_v26 = vld [vmem:[#allocation2 + $0x5c8] sm:$0xff] }
 0x136   :  { %1738 = vmatpush1.bf16.msra.mxu1 %v1737_v56  ;;  %1770 = vmatpush1.bf16.msra.mxu0 %v1769_v41  ;;  %v667_v56 = vld [vmem:[#allocation2 + $0x3b8] sm:$0xff]  ;;  %v1785_v41 = vpack.c.bf16 %v658_v40, %v650_v39 }
 0x137   :  { %1740 = vmatprep.subr.bf16.mxu1 %v1739_v42  ;;  %1772 = vmatprep.subr.bf16.mxu0 %v1771_v44  ;;  %v674_v44 = vld [vmem:[#allocation2 + $0x3f0] sm:$0xff]  ;;  %v1064_v39 = vld [vmem:[#allocation2 + $0x498] sm:$0xff] }
 0x138   :  { %v1072_v40 = vld [vmem:[#allocation2 + $0x4d8] sm:$0xff] }
 0x13a   :  { %1742 = vmatpush1.bf16.msra.mxu1 %v1741_v50  ;;  %1774 = vmatpush1.bf16.msra.mxu0 %v1773_v52  ;;  %v1053_v52 = vld [vmem:[#allocation2 + $0x440] sm:$0xff] }
 0x13b   :  { %1792 = vmatprep.subr.bf16.mxu0 %v2033_v3  ;;  %1744 = vmatprep.subr.bf16.mxu1 %v1743_v55  ;;  %v1489_v3 = vld [vmem:[%s2269_s0 + $0x28] sm:$0xff]  ;;  %v1825_v62 = vpack.c.bf16 %v1053_v52, %v1045_v51  ;;  %v1079_v51 = vld [vmem:[#allocation2 + $0x510] sm:$0xff] }
 0x13c   :  { %v1062_v55 = vld [vmem:[#allocation2 + $0x488] sm:$0xff]  ;;  %v1087_v52 = vld [vmem:[#allocation2 + $0x550] sm:$0xff] }
 0x200   :  { %v1561_v63 = vpop.f32.mrb[4].mxu0 }
 0x201   :  { %v1562_v0 = vpop.f32.mrb[5].mxu0 }
 0x202   :  { %v2213_v5 = vadd.f32 %v1562_v0, %v1561_v63  ;;  %v1061_v0 = vld [vmem:[#allocation2 + $0x480] sm:$0xff] }
 0x204   :  { %1484 = vmatmul.mubr.msk.f32.vlgmr.msra.gmra.mrb[0].mxu1 %vm201_vm0, %v2213_v5  ;;  %1486 = vmatmul.mubr.msk.f32.vlgmr.msra.gmra.mrb[2].mxu0 %vm201_vm0, %v2213_v5 }
 0x205   :  { %1746 = vmatpush1.bf16.msra.mxu1 %v1745_v4  ;;  %1794 = vmatpush3.bf16.msra.mxu0 %v2044_v7  ;;  %v1755_v7 = vpack.c.bf16 %v671_v23, %v663_v22  ;;  %v1069_v4 = vld [vmem:[#allocation2 + $0x4c0] sm:$0xff] }
 0x206   :  { %1748 = vmatprep.subr.bf16.mxu1 %v1747_v6  ;;  %1796 = vmatprep.subr.bf16.mxu0 %v2046_v8  ;;  %v627_v8 = vld [vmem:[#allocation2 + $0x278] sm:$0xff]  ;;  %v1859_v6 = vpack.c.bf16 %v1074_v61, %v1066_v60  ;;  %v1085_v22 = vld [vmem:[#allocation2 + $0x540] sm:$0xff] }
 0x207   :  { %814 = vmatprep.mubr.f32.mxu1 %v1985_v48  ;;  %1038 = vmatprep.mubr.f32.mxu0 %v1489_v3  ;;  %v1775_v30 = vpack.c.bf16 %v627_v8, %v619_v27  ;;  %v1082_v3 = vld [vmem:[#allocation2 + $0x528] sm:$0xff]  ;;  %v1835_v8 = vpack.c.bf16 %v1102_v26, %v1094_v25  ;;  %v1052_v60 = vld [vmem:[#allocation2 + $0x438] sm:$0xff]  ;;  %v1107_v25 = vld [vmem:[#allocation2 + $0x5f0] sm:$0xff] }
 0x208   :  { %v1060_v61 = vld [vmem:[#allocation2 + $0x478] sm:$0xff] }
 0x209   :  { %1750 = vmatpush1.bf16.msra.mxu1 %v1749_v16  ;;  %1798 = vmatpush3.bf16.msra.mxu0 %v2062_v13  ;;  %v635_v13 = vld [vmem:[#allocation2 + $0x2b8] sm:$0xff]  ;;  %v1090_v16 = vld [vmem:[#allocation2 + $0x568] sm:$0xff] }
 0x20a   :  { %1752 = vmatprep.subr.bf16.mxu1 %v1751_v17  ;;  %1800 = vmatprep.subr.bf16.mxu0 %v2065_v14  ;;  %v1777_v14 = vpack.c.bf16 %v626_v33, %v618_v31  ;;  %v1779_v35 = vpack.c.bf16 %v643_v34, %v635_v13  ;;  %v1861_v17 = vpack.c.bf16 %v1073_v11, %v1065_v9  ;;  %v1098_v31 = vld [vmem:[#allocation2 + $0x5a8] sm:$0xff]  ;;  %v1097_v34 = vld [vmem:[#allocation2 + $0x5a0] sm:$0xff]  ;;  %v1067_v11 = vld [vmem:[#allocation2 + $0x4b0] sm:$0xff] }
 0x20b   :  { %v1863_v23 = vpack.c.bf16 %v1090_v16, %v1082_v3  ;;  %v1106_v13 = vld [vmem:[#allocation2 + $0x5e8] sm:$0xff]  ;;  %v1092_v3 = vld [vmem:[#allocation2 + $0x578] sm:$0xff]  ;;  %v1877_v16 = vpack.c.bf16 %v1075_v12, %v1067_v11 }
 0x20d   :  { %1754 = vmatpush1.bf16.msra.mxu1 %v1753_v24  ;;  %1802 = vmatpush3.bf16.msra.mxu0 %v2080_v19  ;;  %v651_v19 = vld [vmem:[#allocation2 + $0x338] sm:$0xff]  ;;  %v1081_v24 = vld [vmem:[#allocation2 + $0x520] sm:$0xff] }
 0x20e   :  { %1756 = vmatprep.subr.bf16.mxu1 %v1755_v7  ;;  %1804 = vmatprep.subr.bf16.mxu0 %v2083_v20  ;;  %v1781_v20 = vpack.c.bf16 %v642_v37, %v634_v36  ;;  %v1089_v7 = vld [vmem:[#allocation2 + $0x560] sm:$0xff]  ;;  %v1048_v37 = vld [vmem:[#allocation2 + $0x418] sm:$0xff] }
 0x20f   :  { %v1865_v27 = vpack.c.bf16 %v1089_v7, %v1081_v24  ;;  %v1099_v7 = vld [vmem:[#allocation2 + $0x5b0] sm:$0xff] }
 0x210   :  { %v1885_v26 = vpack.c.bf16 %v1107_v25, %v1099_v7 }
 0x211   :  { %1758 = vmatpush1.bf16.msra.mxu1 %v1757_v29  ;;  %1806 = vmatpush3.bf16.msra.mxu0 %v2101_v28  ;;  %v1783_v28 = vpack.c.bf16 %v659_v38, %v651_v19  ;;  %v1093_v29 = vld [vmem:[#allocation2 + $0x580] sm:$0xff]  ;;  %v1056_v19 = vld [vmem:[#allocation2 + $0x458] sm:$0xff] }
 0x212   :  { %1776 = vmatprep.subr.bf16.mxu1 %v1775_v30  ;;  %1808 = vmatprep.subr.bf16.mxu0 %v2107_v32  ;;  %v675_v32 = vld [vmem:[#allocation2 + $0x3f8] sm:$0xff]  ;;  %v1101_v30 = vld [vmem:[#allocation2 + $0x5c0] sm:$0xff]  ;;  %v1839_v38 = vpack.c.bf16 %v1056_v19, %v1048_v37 }
 0x213   :  { %v1787_v42 = vpack.c.bf16 %v675_v32, %v667_v56  ;;  %v1837_v33 = vpack.c.bf16 %v1101_v30, %v1093_v29  ;;  %v490_v29 = vlaneseq }
 0x214   :  { %1485 = vmatmul.mubr.msk.f32.vlgmr.msra.gmra.mrb[2].mxu1 %vm201_vm0, %v2213_v5 }
 0x215   :  { %1778 = vmatpush1.bf16.msra.mxu1 %v1777_v14  ;;  %1810 = vmatpush3.bf16.msra.mxu0 %v2119_v43  ;;  %v666_v43 = vld [vmem:[#allocation2 + $0x3b0] sm:$0xff]  ;;  %v1105_v14 = vld [vmem:[#allocation2 + $0x5e0] sm:$0xff] }
 0x216   :  { %1780 = vmatprep.subr.bf16.mxu1 %v1779_v35  ;;  %1812 = vmatprep.subr.bf16.mxu0 %v2125_v47  ;;  %v1050_v47 = vld [vmem:[#allocation2 + $0x428] sm:$0xff]  ;;  %v1789_v50 = vpack.c.bf16 %v674_v44, %v666_v43  ;;  %v1867_v35 = vpack.c.bf16 %v1106_v13, %v1098_v31  ;;  %v1869_v36 = vpack.c.bf16 %v1105_v14, %v1097_v34  ;;  %v1063_v44 = vld [vmem:[#allocation2 + $0x490] sm:$0xff] }
 0x217   :  { %956 = vmatprep.mubr.f32.mxu1 %v1985_v48  ;;  %v1855_v53 = vpack.c.bf16 %v1058_v49, %v1050_v47  ;;  %v1843_v43 = vpack.c.bf16 %v1072_v40, %v1064_v39  ;;  %v1088_v47 = vld [vmem:[#allocation2 + $0x558] sm:$0xff] }
 0x219   :  { %1782 = vmatpush1.bf16.msra.mxu1 %v1781_v20  ;;  %1814 = vmatpush3.bf16.msra.mxu0 %v2137_v57  ;;  %v1823_v57 = vpack.c.bf16 %v1054_v46, %v1046_v45  ;;  %v1047_v20 = vld [vmem:[#allocation2 + $0x410] sm:$0xff]  ;;  %v1080_v46 = vld [vmem:[#allocation2 + $0x518] sm:$0xff] }
 0x21a   :  { %1784 = vmatprep.subr.bf16.mxu1 %v1783_v28  ;;  %1816 = vmatprep.subr.bf16.mxu0 %v2140_v59  ;;  %v1057_v59 = vld [vmem:[#allocation2 + $0x460] sm:$0xff]  ;;  %v1055_v28 = vld [vmem:[#allocation2 + $0x450] sm:$0xff] }
 0x21b   :  { %v1857_v63 = vpack.c.bf16 %v1057_v59, %v1049_v54  ;;  %v1071_v45 = vld [vmem:[#allocation2 + $0x4d0] sm:$0xff]  ;;  %v1849_v54 = vpack.c.bf16 %v1087_v52, %v1079_v51 }
 0x21c   :  { %v1845_v49 = vpack.c.bf16 %v1071_v45, %v1063_v44 }
 0x21d   :  { %1786 = vmatpush1.bf16.msra.mxu1 %v1785_v41  ;;  %1818 = vmatpush3.bf16.msra.mxu0 %v2155_v1  ;;  %v1488_v1 = vld [vmem:[%s2269_s0 + $0x20] sm:$0xff]  ;;  %v1841_v41 = vpack.c.bf16 %v1055_v28, %v1047_v20 }
 0x21e   :  { %1788 = vmatprep.subr.bf16.mxu1 %v1787_v42  ;;  %1820 = vmatprep.subr.bf16.mxu0 %v2158_v2  ;;  %v1827_v2 = vpack.c.bf16 %v1070_v58, %v1062_v55  ;;  %v1095_v55 = vld [vmem:[#allocation2 + $0x590] sm:$0xff] }
 0x21f   :  { %v1103_v58 = vld [vmem:[#allocation2 + $0x5d0] sm:$0xff] }
 0x221   :  { %1790 = vmatpush1.bf16.msra.mxu1 %v1789_v50  ;;  %1822 = vmatpush3.bf16.msra.mxu0 %v2167_v10  ;;  %v1829_v10 = vpack.c.bf16 %v1069_v4, %v1061_v0  ;;  %v1847_v50 = vpack.c.bf16 %v1088_v47, %v1080_v46  ;;  %v1059_v0 = vld [vmem:[#allocation2 + $0x470] sm:$0xff]  ;;  %v1068_v4 = vld [vmem:[#allocation2 + $0x4b8] sm:$0xff] }
 0x222   :  { %1824 = vmatprep.subr.bf16.mxu1 %v1823_v57  ;;  %1856 = vmatprep.subr.bf16.mxu0 %v1855_v53  ;;  %v1096_v57 = vld [vmem:[#allocation2 + $0x598] sm:$0xff] }
 0x223   :  { %v1104_v53 = vld [vmem:[#allocation2 + $0x5d8] sm:$0xff] }
 0x224   :  { %1487 = vmatmul.mubr.msk.f32.vlgmr.msra.gmra.mrb[4].mxu1 %vm201_vm0, %v2213_v5  ;;  %1039 = vmatmul.mubr.f32.vlgmr.msra.gmra.mrb[6].mxu0 %v1488_v1  ;;  %v1833_v5 = vpack.c.bf16 %v1085_v22, %v1077_v18  ;;  %v1851_v59 = vpack.c.bf16 %v1104_v53, %v1096_v57  ;;  %v1853_v1 = vpack.c.bf16 %v1103_v58, %v1095_v55  ;;  %v1091_v18 = vld [vmem:[#allocation2 + $0x570] sm:$0xff]  ;;  %v1108_v22 = vld [vmem:[#allocation2 + $0x5f8] sm:$0xff] }
 0x225   :  { %1826 = vmatpush1.bf16.msra.mxu1 %v1825_v62  ;;  %1858 = vmatpush1.bf16.msra.mxu0 %v1857_v63  ;;  %v1871_v62 = vpack.c.bf16 %v1060_v61, %v1052_v60  ;;  %v1051_v63 = vld [vmem:[#allocation2 + $0x430] sm:$0xff] }
 0x226   :  { %1828 = vmatprep.subr.bf16.mxu1 %v1827_v2  ;;  %1860 = vmatprep.subr.bf16.mxu0 %v1859_v6  ;;  %v1076_v2 = vld [vmem:[#allocation2 + $0x4f8] sm:$0xff]  ;;  %v1873_v6 = vpack.c.bf16 %v1059_v0, %v1051_v63 }
 0x227   :  { %1176 = vmatprep.mubr.f32.mxu1 %v1985_v48  ;;  %1318 = vmatprep.mubr.f32.mxu0 %v1985_v48  ;;  %v1875_v9 = vpack.c.bf16 %v1076_v2, %v1068_v4 }
 0x229   :  { %1830 = vmatpush1.bf16.msra.mxu1 %v1829_v10  ;;  %1862 = vmatpush1.bf16.msra.mxu0 %v1861_v17  ;;  %v1879_v10 = vpack.c.bf16 %v1092_v3, %v1084_v15  ;;  %v1083_v17 = vld [vmem:[#allocation2 + $0x530] sm:$0xff] }
 0x22a   :  { %1832 = vmatprep.subr.bf16.mxu1 %v1831_v21  ;;  %1864 = vmatprep.subr.bf16.mxu0 %v1863_v23  ;;  %v1100_v21 = vld [vmem:[#allocation2 + $0x5b8] sm:$0xff]  ;;  %v1881_v23 = vpack.c.bf16 %v1091_v18, %v1083_v17 }
 0x22b   :  { %v1883_v24 = vpack.c.bf16 %v1108_v22, %v1100_v21 }
 0x22d   :  { %1834 = vmatpush1.bf16.msra.mxu1 %v1833_v5  ;;  %1866 = vmatpush1.bf16.msra.mxu0 %v1865_v27 }
 0x22e   :  { %1836 = vmatprep.subr.bf16.mxu1 %v1835_v8  ;;  %1868 = vmatprep.subr.bf16.mxu0 %v1867_v35 }
 0x231   :  { %1838 = vmatpush1.bf16.msra.mxu1 %v1837_v33  ;;  %1870 = vmatpush1.bf16.msra.mxu0 %v1869_v36  ;;  %v491_v33 = vshrl.u32 %v490_v29, 7  ;;  %v32_v36 = vld [vmem:[%s2272_s3] sm:$0xff]  ;;  %s1986_s3 = smov [#allocation5]  }
 0x232   :  { %1840 = vmatprep.subr.bf16.mxu1 %v1839_v38  ;;  %s1469_s24 = sshll.u32 %s1986_s3, 4  ;;  %s1470_s24 = int_to_ptr.vmem [resolvable:$true] %s1469_s24 }
 0x233   :  { %v492_v13 = vsub.s32 0, %v491_v33  ;;  %v508_v34 = vsub.s32 4, %v491_v33  ;;  %v496_v14 = vsub.s32 1, %v491_v33  ;;  %v512_v35 = vsub.s32 5, %v491_v33  ;;  %s1956_s25 = scalar_lea.vmem %s1470_s24, 1024  ;;  %p1961_p9 = scmp.lt.s32.totalorder %s1470_s24, %s1470_s24 }
 0x234   :  { %v500_v37 = vsub.s32 2, %v491_v33  ;;  %v504_v19 = vsub.s32 3, %v491_v33  ;;  %v516_v38 = vsub.s32 6, %v491_v33  ;;  %v520_v20 = vsub.s32 7, %v491_v33  ;;  %p1957_p8 = scmp.ne.s32.totalorder %s1470_s24, %s1956_s25  ;;  %p1962_p10 = scmp.lt.s32.totalorder %s1956_s25, %s1956_s25 }
 0x235   :  { %v493_v28 = vrot.slane %v32_v36, %v492_v13  ;;  %v509_v39 = vrot.slane %v32_v36, %v508_v34  ;;  %v497_v40 = vrot.slane %v32_v36, %v496_v14 }
 0x236   :  { %p1963_p11 = por %p1962_p10, %p1961_p9 }
 0x238   :  { %p1964_p12 = pnand %p1963_p11, %p1957_p8 }
 0x2f7   :  { %v1596_v56 = vpop.f32.mrb[6].mxu0 }
 0x2f8   :  { %v1597_v32 = vpop.f32.mrb[7].mxu0 }
 0x2f9   :  { %v1598_v42 = vadd.f32 %v1597_v32, %v1596_v56  ;;  %v513_v56 = vrot.slane %v32_v36, %v512_v35  ;;  %v501_v32 = vrot.slane %v32_v36, %v500_v37 }
 0x2fb   :  { %1490 = vmatmul.mubr.msk.f32.vlgmr.msra.gmra.mrb[0].mxu1 %vm201_vm0, %v1598_v42  ;;  %1492 = vmatmul.mubr.msk.f32.vlgmr.msra.gmra.mrb[2].mxu0 %vm201_vm0, %v1598_v42 }
 0x2fc   :  { %1842 = vmatpush1.bf16.msra.mxu1 %v1841_v41  ;;  %1247 = vmatprep.mubr.f32.mxu1 %v1985_v48  ;;  %v505_v41 = vrot.slane %v32_v36, %v504_v19 }
 0x2fd   :  { %1844 = vmatprep.subr.bf16.mxu1 %v1843_v43  ;;  %v521_v43 = vrot.slane %v32_v36, %v520_v20 }
 0x300   :  { %1846 = vmatpush1.bf16.msra.mxu1 %v1845_v49 }
 0x301   :  { %1848 = vmatprep.subr.bf16.mxu1 %v1847_v50 }
 0x304   :  { %1850 = vmatpush1.bf16.msra.mxu1 %v1849_v54 }
 0x305   :  { %1852 = vmatprep.subr.bf16.mxu1 %v1851_v59 }
 0x308   :  { %1854 = vmatpush1.bf16.msra.mxu1 %v1853_v1 }
 0x309   :  { %1872 = vmatprep.subr.bf16.mxu1 %v1871_v62 }
 0x30b   :  { %1491 = vmatmul.mubr.msk.f32.vlgmr.msra.gmra.mrb[2].mxu1 %vm201_vm0, %v1598_v42 }
 0x30c   :  { %1874 = vmatpush1.bf16.msra.mxu1 %v1873_v6  ;;  %1389 = vmatprep.mubr.f32.mxu1 %v1985_v48 }
 0x30d   :  { %1876 = vmatprep.subr.bf16.mxu1 %v1875_v9 }
 0x310   :  { %1878 = vmatpush1.bf16.msra.mxu1 %v1877_v16 }
 0x311   :  { %1880 = vmatprep.subr.bf16.mxu1 %v1879_v10 }
 0x314   :  { %1882 = vmatpush1.bf16.msra.mxu1 %v1881_v23 }
 0x315   :  { %1884 = vmatprep.subr.bf16.mxu1 %v1883_v24 }
 0x318   :  { %1886 = vmatpush1.bf16.msra.mxu1 %v1885_v26 }
 0x31b   :  { %1493 = vmatmul.mubr.msk.f32.vlgmr.msra.gmra.mrb[4].mxu1 %vm201_vm0, %v1598_v42  ;;  %v517_v42 = vrot.slane %v32_v36, %v516_v38 }
 0x3ce   :  { %v1178_v5 = vpop.f32.mrb[0].mxu1  ;;  %v1320_v48 = vpop.f32.mrb[2].mxu0 }
 0x3cf   :  { %v1180_v27 = vpop.f32.mrb[1].mxu1  ;;  %v1322_v8 = vpop.f32.mrb[3].mxu0  ;;  %v1887_v44 = vadd.f32 %v1178_v5, %v493_v28  ;;  %v1891_v45 = vadd.f32 %v1320_v48, %v509_v39 }
 0x3d0   :  { %v1888_v46 = vadd.f32 %v1180_v27, %v497_v40  ;;  %v1892_v47 = vadd.f32 %v1322_v8, %v513_v56 }
 0x3d1   :  { %v1404_v57 = vmax.f32 %v1887_v44, %v1891_v45 }
 0x3d2   :  { %v1405_v53 = vmax.f32 %v1888_v46, %v1892_v47 }
 0x3d4   :  { %v1408_v60 = vmax.f32 %v1404_v57, %v1405_v53 }
 0x3de   :  { %v1249_v30 = vpop.f32.mrb[2].mxu1 }
 0x3df   :  { %v1251_v31 = vpop.f32.mrb[3].mxu1  ;;  %v1889_v50 = vadd.f32 %v1249_v30, %v501_v32 }
 0x3e0   :  { %v1890_v54 = vadd.f32 %v1251_v31, %v505_v41 }
 0x3ee   :  { %v1391_v49 = vpop.f32.mrb[4].mxu1 }
 0x3ef   :  { %v1893_v51 = vadd.f32 %v1391_v49, %v517_v42  ;;  %v1393_v52 = vpop.f32.mrb[5].mxu1 }
 0x3f0   :  { %v1894_v59 = vadd.f32 %v1393_v52, %v521_v43 }
 0x3f1   :  { %v1406_v55 = vmax.f32 %v1889_v50, %v1893_v51 }
 0x3f2   :  { %v1407_v58 = vmax.f32 %v1890_v54, %v1894_v59 }
 0x3f4   :  { %v1409_v61 = vmax.f32 %v1406_v55, %v1407_v58 }
 0x3f6   :  { %v1410_v1 = vmax.f32 %v1408_v60, %v1409_v61 }
 0x3f8   :  { %1411 = vmax.xlane.f32.xlu0 %v1410_v1 }
 0x485   :  { %v1412_v62 = vpop.xlane.xlu0 %1411 }
 0x486   :  { %v1413_v63 = vsub.f32 %v1887_v44, %v1412_v62  ;;  %v1414_v0 = vsub.f32 %v1888_v46, %v1412_v62  ;;  %v1415_v4 = vsub.f32 %v1889_v50, %v1412_v62  ;;  %v1416_v2 = vsub.f32 %v1890_v54, %v1412_v62 }
 0x487   :  { %v1417_v12 = vsub.f32 %v1891_v45, %v1412_v62  ;;  %v1418_v3 = vsub.f32 %v1892_v47, %v1412_v62  ;;  %v1419_v16 = vsub.f32 %v1893_v51, %v1412_v62  ;;  %v1420_v17 = vsub.f32 %v1894_v59, %v1412_v62 }
 0x488   :  { %v1421_v6 = vmul.f32 1.442695, %v1413_v63  ;;  %v1423_v9 = vmul.f32 1.442695, %v1414_v0  ;;  %v1425_v11 = vmul.f32 1.442695, %v1415_v4 }
 0x489   :  { %v1427_v15 = vmul.f32 1.442695, %v1416_v2  ;;  %v1429_v10 = vmul.f32 1.442695, %v1417_v12  ;;  %v1431_v18 = vmul.f32 1.442695, %v1418_v3 }
 0x48a   :  { %1916 = vpow2.f32 %v1421_v6  ;;  %v1433_v21 = vmul.f32 1.442695, %v1419_v16  ;;  %v1435_v22 = vmul.f32 1.442695, %v1420_v17 }
 0x48b   :  { %1918 = vpow2.f32 %v1423_v9 }
 0x48c   :  { %1920 = vpow2.f32 %v1425_v11 }
 0x48d   :  { %1922 = vpow2.f32 %v1427_v15 }
 0x48e   :  { %1924 = vpow2.f32 %v1429_v10 }
 0x48f   :  { %1926 = vpow2.f32 %v1431_v18 }
 0x490   :  { %1928 = vpow2.f32 %v1433_v21 }
 0x491   :  { %1930 = vpow2.f32 %v1435_v22 }
 0x494   :  { %v1917_v23 = vpop.eup %1916 }
 0x495   :  { %v1919_v24 = vpop.eup %1918 }
 0x496   :  { %v1437_v7 = vadd.f32 %v1919_v24, %v1917_v23  ;;  %v1921_v25 = vpop.eup %1920 }
 0x497   :  { %v1923_v5 = vpop.eup %1922 }
 0x498   :  { %v1438_v26 = vadd.f32 %v1921_v25, %v1437_v7  ;;  %v1925_v27 = vpop.eup %1924 }
 0x499   :  { %v1927_v29 = vpop.eup %1926 }
 0x49a   :  { %v1439_v48 = vadd.f32 %v1923_v5, %v1438_v26  ;;  %v1929_v31 = vpop.eup %1928 }
 0x49b   :  { %v1931_v13 = vpop.eup %1930 }
 0x49c   :  { %v1440_v8 = vadd.f32 %v1925_v27, %v1439_v48 }
 0x49e   :  { %v1441_v30 = vadd.f32 %v1927_v29, %v1440_v8 }
 0x4a0   :  { %v1442_v33 = vadd.f32 %v1929_v31, %v1441_v30 }
 0x4a2   :  { %v1443_v34 = vadd.f32 %v1931_v13, %v1442_v33 }
 0x4a4   :  { %1444 = vadd.xlane.f32.xlu0 %v1443_v34 }
 0x531   :  { %v1445_v14 = vpop.xlane.xlu0 %1444 }
 0x532   :  { %1932 = vrcp.f32 %v1445_v14 }
 0x53c   :  { %v1933_v35 = vpop.eup %1932 }
 0x53d   :  { %v1447_v36 = vmul.f32 %v1933_v35, %v1917_v23  ;;  %v1448_v37 = vmul.f32 %v1933_v35, %v1919_v24  ;;  %v1449_v19 = vmul.f32 %v1933_v35, %v1921_v25  ;;  %v1450_v38 = vmul.f32 %v1933_v35, %v1923_v5 }
 0x53e   :  { %v1451_v20 = vmul.f32 %v1933_v35, %v1925_v27  ;;  %v1452_v28 = vmul.f32 %v1933_v35, %v1927_v29  ;;  %v1453_v39 = vmul.f32 %v1933_v35, %v1929_v31  ;;  %v1454_v40 = vmul.f32 %v1933_v35, %v1931_v13 }
 0x53f   :  { %1455 = vst [vmem:[#allocation5] sm:$0xff] %v1447_v36  ;;  %1456 = vst [vmem:[#allocation5 + $0x8] sm:$0xff] %v1448_v37 }
 0x540   :  { %1457 = vst [vmem:[#allocation5 + $0x10] sm:$0xff] %v1449_v19  ;;  %1458 = vst [vmem:[#allocation5 + $0x18] sm:$0xff] %v1450_v38 }
 0x541   :  { %1459 = vst [vmem:[#allocation5 + $0x20] sm:$0xff] %v1451_v20  ;;  %1460 = vst [vmem:[#allocation5 + $0x28] sm:$0xff] %v1452_v28 }
 0x542   :  { %1461 = vst [vmem:[#allocation5 + $0x30] sm:$0xff] %v1453_v39  ;;  %1462 = vst [vmem:[#allocation5 + $0x38] sm:$0xff] %v1454_v40 }
 0x543   :  { %1967 = shalt.err (!%p1964_p12)
}
 0x544   :  { %s1968_s28 = scalar_lea.hbm %s2273_s4, 1024 }
 0x545   :  { %p1969_p13 = scmp.ne.s32.totalorder %s2273_s4, %s1968_s28  ;;  %p1972_p0 = scmp.lt.u32.totalorder %s1968_s28, %s2273_s4 }
 0x547   :  { %p1974_p1 = pnand %p1972_p0, %p1969_p13 }
 0x549   :  { %1977 = shalt.err (!%p1974_p1)
}
 0x54a   :  { %1472 = dma.vmem_to_hbm [thread:$0]  %s1470_s24, 1024, %s2273_s4, [#allocation4]  }
 0x54b   :  { %1980 = dma.done.wait [#allocation4], 1024  }
 0x54c   :  { %1981 = vsyncadd [#allocation4], 4294966272 }
 0x54d   :  { %1476 = vsyncpa [#allocation3], 1 }
 0x54e   :  { %1477 = vsyncpa [#allocation4], 1 }

</bundles_post_ra>
